<compile_context>
chip_gen: v7x
topology: tpu7x:2x2x1
jax: 0.10.0
libtpu: 0.0.40
codegen_flags: <defaults>
</compile_context>

<pallas_src>
import jax
import jax.numpy as jnp
from jax.experimental import pallas as pl
from jax.experimental.pallas import tpu as pltpu


def _round_up(x, m):
    return (x + m - 1) // m * m


def _embed_kernel(tok_ids_ref, pos_ids_ref, tok_tab_ref, pos_tab_ref, out_ref):
    # tok_ids_ref / pos_ids_ref : (R, 1)  int32    row-block of flattened ids
    # tok_tab_ref               : (V, D)  float32  full token table (VMEM resident)
    # pos_tab_ref               : (T, D)  float32  rows [0, T) of positional table
    # out_ref                   : (R, D)  float32
    R = out_ref.shape[0]
    tok_tab = tok_tab_ref[...]
    pos_tab = pos_tab_ref[...]
    V = tok_tab.shape[0]
    P = pos_tab.shape[0]

    tok_ids = tok_ids_ref[...]                       # (R, 1)
    pos_ids = pos_ids_ref[...]                       # (R, 1)

    # One-hot gather on the MXU: (R, V) @ (V, D)  and  (R, P) @ (P, D).
    tok_oh = (jax.lax.broadcasted_iota(jnp.int32, (R, V), 1) == tok_ids).astype(jnp.float32)
    pos_oh = (jax.lax.broadcasted_iota(jnp.int32, (R, P), 1) == pos_ids).astype(jnp.float32)

    emb = jnp.dot(tok_oh, tok_tab, preferred_element_type=jnp.float32)
    emb = emb + jnp.dot(pos_oh, pos_tab, preferred_element_type=jnp.float32)

    # Dropout = identity (inference semantics).
    out_ref[...] = emb.astype(out_ref.dtype)


def embedding_with_positional_encoding(inp_ids, tok_emb, pos_emb, *, rows_per_block=256):
    """inp_ids: (B, T) int token ids -> (B, T, D) float32 embeddings."""
    B, T = inp_ids.shape
    V, D = tok_emb.shape
    assert pos_emb.shape[0] >= T, "sequence longer than max_seq_len"

    tok_tab = tok_emb.astype(jnp.float32)            # (V, D)
    pos_tab = pos_emb[:T].astype(jnp.float32)        # (T, D)

    # Flatten all (b, t) rows and block them so every grid step has many rows.
    N = B * T
    R = _round_up(min(rows_per_block, _round_up(N, 8)), 8)
    N_pad = _round_up(N, R)
    pad = N_pad - N

    tok_ids = jnp.pad(inp_ids.reshape(-1).astype(jnp.int32), (0, pad))[:, None]   # (N_pad, 1)
    pos_ids = jnp.pad(jnp.arange(N, dtype=jnp.int32) % T, (0, pad))[:, None]      # (N_pad, 1)
    # (padded rows use index 0 -> always valid; they are sliced off below)

    out = pl.pallas_call(
        _embed_kernel,
        out_shape=jax.ShapeDtypeStruct((N_pad, D), jnp.float32),
        grid=(N_pad // R,),
        in_specs=[
            pl.BlockSpec((R, 1), lambda i: (i, 0)),      # token ids for this row block
            pl.BlockSpec((R, 1), lambda i: (i, 0)),      # position ids for this row block
            pl.BlockSpec((V, D), lambda i: (0, 0)),      # token table (constant -> fetched once)
            pl.BlockSpec((T, D), lambda i: (0, 0)),      # positional table (constant)
        ],
        out_specs=pl.BlockSpec((R, D), lambda i: (i, 0)),
        compiler_params=pltpu.CompilerParams(dimension_semantics=("parallel",)),
    )(tok_ids, pos_ids, tok_tab, pos_tab)

    return out[:N].reshape(B, T, D)


if __name__ == "__main__":
    vocab_size, d_model, max_seq_len = 64, 32, 40
    B, T = 2, 8

    key = jax.random.PRNGKey(0)
    k_tok, k_pos, k_ids = jax.random.split(key, 3)
    tok_emb = (0.02 * jax.random.normal(k_tok, (vocab_size, d_model))).astype(jnp.float32)
    pos_emb = (0.02 * jax.random.normal(k_pos, (max_seq_len, d_model))).astype(jnp.float32)
    inp_ids = jax.random.randint(k_ids, (B, T), 0, vocab_size, dtype=jnp.int32)

    out = embedding_with_positional_encoding(inp_ids, tok_emb, pos_emb)
    jax.block_until_ready(out)

    # Pure-JAX reference (dropout = identity in eval mode).
    ref = tok_emb[inp_ids] + pos_emb[:T][None, :, :]

    assert out.shape == (B, T, d_model)
    assert bool(jnp.all(jnp.isfinite(out)))
    assert bool(jnp.allclose(out, ref, atol=1e-5, rtol=1e-5))
    print("KERNEL_OK")
</pallas_src>

<mosaic_0001>
module attributes {stable_mosaic.version = 11 : i64} {
  func.func @_embed_kernel(%arg0: i32, %arg1: memref<16x1xi32, #tpu.memory_space<vmem>>, %arg2: memref<16x1xi32, #tpu.memory_space<vmem>>, %arg3: memref<64x32xf32, #tpu.memory_space<vmem>>, %arg4: memref<8x32xf32, #tpu.memory_space<vmem>>, %arg5: memref<16x32xf32, #tpu.memory_space<vmem>>) attributes {dimension_semantics = [#tpu.dimension_semantics<parallel>], iteration_bounds = array<i64: 1>, scalar_prefetch = 0 : i64, scratch_operands = 0 : i64, tpu.core_type = #tpu.core_type<tc>, window_params = [{transform_indices = @transform_0, window_bounds = array<i64: 16, 1>}, {transform_indices = @transform_1, window_bounds = array<i64: 16, 1>}, {pipeline_mode = #tpu.pipeline_mode<synchronous>, transform_indices = @transform_2, window_bounds = array<i64: 64, 32>}, {pipeline_mode = #tpu.pipeline_mode<synchronous>, transform_indices = @transform_3, window_bounds = array<i64: 8, 32>}, {transform_indices = @transform_4, window_bounds = array<i64: 16, 32>}]} {
    %c0 = arith.constant 0 : index
    %c0_0 = arith.constant 0 : index
    %0 = vector.load %arg3[%c0, %c0_0] : memref<64x32xf32, #tpu.memory_space<vmem>>, vector<64x32xf32>
    %c0_1 = arith.constant 0 : index
    %c0_2 = arith.constant 0 : index
    %1 = vector.load %arg4[%c0_1, %c0_2] : memref<8x32xf32, #tpu.memory_space<vmem>>, vector<8x32xf32>
    %c0_3 = arith.constant 0 : index
    %c0_4 = arith.constant 0 : index
    %2 = vector.load %arg1[%c0_3, %c0_4] : memref<16x1xi32, #tpu.memory_space<vmem>>, vector<16x1xi32>
    %c0_5 = arith.constant 0 : index
    %c0_6 = arith.constant 0 : index
    %3 = vector.load %arg2[%c0_5, %c0_6] : memref<16x1xi32, #tpu.memory_space<vmem>>, vector<16x1xi32>
    %4 = tpu.iota {dimensions = array<i32: 1>} : vector<16x64xi32>
    %5 = vector.broadcast %2 : vector<16x1xi32> to vector<16x64xi32>
    %6 = arith.cmpi eq, %4, %5 : vector<16x64xi32>
    %7 = arith.extui %6 : vector<16x64xi1> to vector<16x64xi32>
    %8 = arith.sitofp %7 : vector<16x64xi32> to vector<16x64xf32>
    %9 = tpu.iota {dimensions = array<i32: 1>} : vector<16x8xi32>
    %10 = vector.broadcast %3 : vector<16x1xi32> to vector<16x8xi32>
    %11 = arith.cmpi eq, %9, %10 : vector<16x8xi32>
    %12 = arith.extui %11 : vector<16x8xi1> to vector<16x8xi32>
    %13 = arith.sitofp %12 : vector<16x8xi32> to vector<16x8xf32>
    %cst = arith.constant dense<0.000000e+00> : vector<16x32xf32>
    %14 = tpu.matmul %8, %0, %cst {dimension_numbers = #tpu.dot_dimension_numbers<[1], [0], [0], [1], [0, 0, 1, 1], [], []>} : vector<16x64xf32>, vector<64x32xf32>, vector<16x32xf32> -> vector<16x32xf32>
    %cst_7 = arith.constant dense<0.000000e+00> : vector<16x32xf32>
    %15 = tpu.matmul %13, %1, %cst_7 {dimension_numbers = #tpu.dot_dimension_numbers<[1], [0], [0], [1], [0, 0, 1, 1], [], []>} : vector<16x8xf32>, vector<8x32xf32>, vector<16x32xf32> -> vector<16x32xf32>
    %16 = arith.addf %14, %15 : vector<16x32xf32>
    %c0_8 = arith.constant 0 : index
    %c0_9 = arith.constant 0 : index
    %17 = vector.load %arg5[%c0_8, %c0_9] : memref<16x32xf32, #tpu.memory_space<vmem>>, vector<16x32xf32>
    tpu.vector_store %arg5[%c0_8, %c0_9], %16 {strides = array<i32>} : memref<16x32xf32, #tpu.memory_space<vmem>>, vector<16x32xf32>,
    return
  }
  func.func @transform_0(%arg0: i32) -> (i32, i32) {
    %c0_i32 = arith.constant 0 : i32
    %c0_i32_0 = arith.constant 0 : i32
    return %arg0, %c0_i32 : i32, i32
  }
  func.func @transform_1(%arg0: i32) -> (i32, i32) {
    %c0_i32 = arith.constant 0 : i32
    %c0_i32_0 = arith.constant 0 : i32
    return %arg0, %c0_i32 : i32, i32
  }
  func.func @transform_2(%arg0: i32) -> (i32, i32) {
    %c0_i32 = arith.constant 0 : i32
    %c0_i32_0 = arith.constant 0 : i32
    %c0_i32_1 = arith.constant 0 : i32
    return %c0_i32, %c0_i32_0 : i32, i32
  }
  func.func @transform_3(%arg0: i32) -> (i32, i32) {
    %c0_i32 = arith.constant 0 : i32
    %c0_i32_0 = arith.constant 0 : i32
    %c0_i32_1 = arith.constant 0 : i32
    return %c0_i32, %c0_i32_0 : i32, i32
  }
  func.func @transform_4(%arg0: i32) -> (i32, i32) {
    %c0_i32 = arith.constant 0 : i32
    %c0_i32_0 = arith.constant 0 : i32
    return %arg0, %c0_i32 : i32, i32
  }
}

</mosaic_0001>

<bundles_post_ra>
// kernel: tpu_custom_call.1
= control target key start
LH: loop header
LB: loop body
LE: loop exit
PB: predicated region body
PF: predicated region fallthrough
CT: control target
= control target key end

     0   :  { %v334_v2 = vmov 0   ;;  %s415_s0 = inlined_call_operand.vmem [shape: s32[16,1], index: 0, kind: input, shape index: {}]   ;;  %s416_s1 = inlined_call_operand.vmem [shape: s32[16,1], index: 1, kind: input, shape index: {}]   ;;  %s417_s2 = inlined_call_operand.vmem [shape: f32[64,32], index: 2, kind: input, shape index: {}]   ;;  %s418_s3 = inlined_call_operand.vmem [shape: f32[8,32], index: 3, kind: input, shape index: {}]   ;;  %s419_s4 = inlined_call_operand.hbm [shape: f32[16,32], index: 4, kind: output, shape index: {}]  }
   0x1   :  { %v28_v0 = vld [vmem:[%s415_s0 + $0x8] sm:$0xff]  ;;  %v27_v1 = vld [vmem:[%s415_s0] sm:$0xff]  ;;  %309 = vset.pattern.permute.xlu1 %v334_v2  ;;  %308 = vset.pattern.permute.xlu0 %v334_v2  ;;  %v20_v7 = vld [vmem:[%s417_s2 + $0x10] sm:$0xff] }
   0x2   :  { %v18_v3 = vld [vmem:[%s417_s2] sm:$0xff]  ;;  %v19_v4 = vld [vmem:[%s417_s2 + $0x8] sm:$0xff]  ;;  %37 = vperm.xlu1 %309, %v28_v0   ;;  %34 = vperm.xlu0 %308, %v27_v1   ;;  %v21_v8 = vld [vmem:[%s417_s2 + $0x18] sm:$0xff] }
   0x3   :  { %v30_v5 = vld [vmem:[%s416_s1 + $0x8] sm:$0xff]  ;;  %v285_v6 = vpack.c.bf16 %v19_v4, %v18_v3  ;;  %v29_v9 = vld [vmem:[%s416_s1] sm:$0xff]  ;;  %v289_v10 = vpack.c.bf16 %v21_v8, %v20_v7 }
   0x4   :  { %v22_v11 = vld [vmem:[%s417_s2 + $0x20] sm:$0xff]  ;;  %v23_v12 = vld [vmem:[%s417_s2 + $0x28] sm:$0xff] }
   0x5   :  { %286 = vmatprep.subr.bf16.mxu0 %v285_v6 }
   0x6   :  { %9 = vsyncpa [#allocation3], 0  ;;  %288 = vmatpush3.bf16.msra.mxu0 %v285_v6  ;;  %49 = vperm.xlu1 %309, %v30_v5   ;;  %v293_v13 = vpack.c.bf16 %v23_v12, %v22_v11  ;;  %v26_v14 = vld [vmem:[%s418_s3] sm:$0xff]  ;;  %v24_v15 = vld [vmem:[%s417_s2 + $0x30] sm:$0xff]  ;;  %v31_v18 = vlaneseq  ;;  %vm139_vm0 = vcmask 523264   ;;  %v335_v22 = vmov 0.0  }
   0x7   :  { %46 = vperm.xlu0 %308, %v29_v9   ;;  %290 = vmatprep.subr.bf16.mxu0 %v289_v10  ;;  %v25_v16 = vld [vmem:[%s417_s2 + $0x38] sm:$0xff]  ;;  %vm57_vm3 = vcmask 64512   ;;  %s336_s2 = smov [#allocation2]   ;;  %vm221_vm6 = vcmask 261120  }
   0x8   :  { %261 = vmatprep.subr.mxu1 %v26_v14  ;;  %v297_v17 = vpack.c.bf16 %v25_v16, %v24_v15  ;;  %v32_v19 = vand.u32 127, %v31_v18  ;;  %s229_s3 = sshll.u32 %s336_s2, 4  ;;  %s230_s3 = int_to_ptr.vmem [resolvable:$true] %s229_s3 }
   0x9   :  { %262 = vmatpush3.msra.mxu1 %v26_v14  ;;  %s310_s13 = scalar_lea.vmem %s230_s3, 256  ;;  %p315_p1 = scmp.lt.s32.totalorder %s230_s3, %s230_s3 }
   0xa   :  { %292 = vmatpush3.bf16.msra.mxu0 %v289_v10  ;;  %p311_p0 = scmp.ne.s32.totalorder %s230_s3, %s310_s13  ;;  %p316_p2 = scmp.lt.s32.totalorder %s310_s13, %s310_s13 }
   0xb   :  { %294 = vmatprep.subr.bf16.mxu0 %v293_v13 }
   0xc   :  { %p317_p3 = por %p316_p2, %p315_p1 }
   0xe   :  { %296 = vmatpush3.bf16.msra.mxu0 %v293_v13  ;;  %p318_p4 = pnand %p317_p3, %p311_p0 }
   0xf   :  { %298 = vmatprep.subr.bf16.mxu0 %v297_v17 }
  0x12   :  { %300 = vmatpush3.bf16.msra.mxu0 %v297_v17 }
  0x81   :  { %v38_v20 = vpop.permute.xlu1 %37  ;;  %v35_v21 = vpop.permute.xlu0 %34 }
  0x82   :  { %vm40_vm1 = vcmp.eq.s32.totalorder %v32_v19, %v38_v20  ;;  %vm39_vm2 = vcmp.eq.s32.totalorder %v32_v19, %v35_v21 }
  0x83   :  { %v241_v23 = vsel %vm40_vm1, 1.0, %v335_v22  ;;  %v240_v24 = vsel %vm39_vm2, 1.0, %v335_v22 }
  0x84   :  { %282 = vmatprep.mubr.msk.f32.mxu0 %vm139_vm0, %v240_v24 }
  0x85   :  { %v50_v25 = vpop.permute.xlu1 %49  ;;  %283 = vmatmul.mubr.msk.f32.vlgmr.msra.gmra.mrb[0].mxu0 %vm139_vm0, %v241_v23 }
  0x86   :  { %v47_v26 = vpop.permute.xlu0 %46  ;;  %vm52_vm4 = vcmp.eq.s32.totalorder %v32_v19, %v50_v25 }
  0x87   :  { %vm51_vm5 = vcmp.eq.s32.totalorder %v32_v19, %v47_v26  ;;  %v243_v27 = vsel %vm52_vm4, 1.0, %v335_v22 }
  0x88   :  { %v242_v28 = vsel %vm51_vm5, 1.0, %v335_v22 }
  0x89   :  { %263 = vmatprep.mubr.msk.f32.mxu1 %vm57_vm3, %v242_v28 }
  0x8a   :  { %264 = vmatmul.mubr.msk.f32.vlgmr.msra.gmra.mrb[0].mxu1 %vm57_vm3, %v243_v27 }
 0x158   :  { %v284_v29 = vpop.f32.mrb[0].mxu0 }
 0x159   :  { %v212_v30 = vpop.f32.mrb[1].mxu0 }
 0x15d   :  { %v265_v31 = vpop.f32.mrb[0].mxu1 }
 0x15e   :  { %v218_v32 = vadd.f32 %v284_v29, %v265_v31  ;;  %v130_v33 = vpop.f32.mrb[1].mxu1 }
 0x15f   :  { %v213_v34 = vadd.f32 %v212_v30, %v130_v33 }
 0x160   :  { %223 = vst.msk [vmem:[#allocation2 + $0x8] sm:$0xff] %vm221_vm6, %v218_v32 }
 0x161   :  { %222 = vst.msk [vmem:[#allocation2] sm:$0xff] %vm221_vm6, %v213_v34 }
 0x162   :  { %321 = shalt.err (!%p318_p4)
}
 0x163   :  { %s322_s16 = scalar_lea.hbm %s419_s4, 256 }
 0x164   :  { %p323_p5 = scmp.ne.s32.totalorder %s419_s4, %s322_s16  ;;  %p326_p6 = scmp.lt.u32.totalorder %s322_s16, %s419_s4 }
 0x166   :  { %p328_p7 = pnand %p326_p6, %p323_p5 }
 0x168   :  { %331 = shalt.err (!%p328_p7)
}
 0x169   :  { %s337_s21 = smov 128   ;;  %s338_s22 = smov 8  }
 0x16a   :  { %235 = dma.vmem_to_hbm [thread:$0]  %s230_s3, 256, %s419_s4, [#allocation3], %s337_s21, %s337_s21, %s338_s22  }
 0x16b   :  { %332 = dma.done.wait [#allocation3], 256  }
 0x16c   :  { %333 = vsyncadd [#allocation3], 4294967040 }
 0x16d   :  { %239 = vsyncpa [#allocation3], 1 }

</bundles_post_ra>
